<compile_context>
chip_gen: v7x
topology: tpu7x:2x2x1
jax: 0.10.0
libtpu: 0.0.40
codegen_flags: <defaults>
</compile_context>

<pallas_src>
import functools

import jax
import jax.numpy as jnp
from jax.experimental import pallas as pl
from jax.experimental.pallas import tpu as pltpu


def _round_up(v, m):
    return ((v + m - 1) // m) * m


def _cdiv(a, b):
    return -(-a // b)


def _vmem_capacity_bytes():
    """Per-TensorCore VMEM capacity; conservative fallback = 64 MiB (v7x)."""
    try:
        info = pltpu.get_tpu_info()
        cap = getattr(info, "vmem_capacity_bytes", None)
        if cap:
            return int(cap)
    except Exception:
        pass
    return 64 * 1024 * 1024


def _vmem_need_bytes(tile_n, d_in, w_tot, out_w, compute_dtype, out_dtype):
    """Rough VMEM footprint for one pipeline configuration."""
    isz = jnp.dtype(compute_dtype).itemsize
    osz = jnp.dtype(out_dtype).itemsize
    need = (2 * tile_n * d_in * isz      # x tile, double-buffered
            + d_in * w_tot * isz         # weights, single-buffered (Buffered(1))
            + 8 * w_tot * 4              # bias (sublane-padded), single-buffered
            + 2 * tile_n * out_w * osz   # packed output tile, double-buffered
            + 2 * tile_n * w_tot * 4)    # f32 matmul result + elementwise temps
    return int(need * 1.25) + (2 << 20)  # compiler-internal scratch headroom


def _cgc_kernel(x_ref, w_ref, b_ref, out_ref, *, dl, d_latent, gate_off):
    # One wide MXU matmul covers all 3 experts + the 2 gate-diff columns.
    h = jnp.dot(x_ref[...], w_ref[...], preferred_element_type=jnp.float32)
    h = h + b_ref[...]

    # Gate logits sliced BEFORE the ReLU (they may live in expert padding lanes).
    # softmax over 2 experts == sigmoid of the logit difference (EUP slot, no
    # XLU reduce, no divide).
    g_pr = jax.nn.sigmoid(h[:, gate_off:gate_off + 1])      # weight on shared (pred head)
    g_x = jax.nn.sigmoid(h[:, gate_off + 1:gate_off + 2])   # weight on shared (x head)

    h_sh = jnp.maximum(h[:, 0 * dl:1 * dl], 0.0)   # shared expert
    h_pr = jnp.maximum(h[:, 1 * dl:2 * dl], 0.0)   # pred expert
    h_x = jnp.maximum(h[:, 2 * dl:3 * dl], 0.0)    # x expert

    res_pred = h_pr + g_pr * (h_sh - h_pr)
    res_x = h_x + g_x * (h_sh - h_x)

    # Pack both heads into one lane-dense output block (wrapper splits them).
    parts = [res_pred[:, :d_latent], res_x[:, :d_latent]]
    pad_w = out_ref.shape[1] - 2 * d_latent
    if pad_w:
        parts.append(jnp.zeros((res_pred.shape[0], pad_w), res_pred.dtype))
    out_ref[...] = jnp.concatenate(parts, axis=1).astype(out_ref.dtype)


def pack_cgc_params(params, compute_dtype=jnp.float32):
    """One-time weight packing (hoisted out of the per-call path)."""
    d_in, d_latent = params["w_sh"].shape
    dl = _round_up(d_latent, 128)
    pad_room = dl - d_latent

    def pad_cols(a, target):
        return jnp.pad(a, ((0, 0), (0, target - a.shape[1])))

    wg_pr_diff = params["wg_pr"][:, 0:1] - params["wg_pr"][:, 1:2]
    wg_x_diff = params["wg_x"][:, 0:1] - params["wg_x"][:, 1:2]
    bg_pr_diff = params["bg_pr"][:, 0:1] - params["bg_pr"][:, 1:2]
    bg_x_diff = params["bg_x"][:, 0:1] - params["bg_x"][:, 1:2]

    if pad_room >= 2:
        # Fold the gate-diff columns into the zero padding of the x-expert block.
        w_tot = 3 * dl
        gate_off = 2 * dl + d_latent
        wx_block = pad_cols(
            jnp.concatenate([params["w_x"], wg_pr_diff, wg_x_diff], axis=1), dl)
        bx_block = pad_cols(
            jnp.concatenate([params["b_x"], bg_pr_diff, bg_x_diff], axis=1), dl)
        w_cat = jnp.concatenate(
            [pad_cols(params["w_sh"], dl), pad_cols(params["w_pr"], dl), wx_block],
            axis=1)
        b_cat = jnp.concatenate(
            [pad_cols(params["b_sh"], dl), pad_cols(params["b_pr"], dl), bx_block],
            axis=1)
    else:
        # d_latent is (nearly) a multiple of 128: append a 128-wide gate block.
        w_tot = 3 * dl + 128
        gate_off = 3 * dl
        w_gate = pad_cols(jnp.concatenate([wg_pr_diff, wg_x_diff], axis=1), 128)
        b_gate = pad_cols(jnp.concatenate([bg_pr_diff, bg_x_diff], axis=1), 128)
        w_cat = jnp.concatenate(
            [pad_cols(params["w_sh"], dl), pad_cols(params["w_pr"], dl),
             pad_cols(params["w_x"], dl), w_gate], axis=1)
        b_cat = jnp.concatenate(
            [pad_cols(params["b_sh"], dl), pad_cols(params["b_pr"], dl),
             pad_cols(params["b_x"], dl), b_gate], axis=1)

    return {
        "w_cat": w_cat.astype(compute_dtype),
        "b_cat": b_cat.astype(jnp.float32),       # bias add stays f32
        "d_input": d_in,
        "d_latent": d_latent,
        "dl": dl,
        "w_tot": w_tot,
        "gate_off": gate_off,
        "compute_dtype": compute_dtype,
    }


def cgc_1_2_apply(x, packed, *, block_n=None, out_dtype=jnp.float32):
    """x: (N, d_input); packed: result of pack_cgc_params."""
    N, d_in = x.shape
    assert d_in == packed["d_input"], "x feature dim mismatch"
    d_latent = packed["d_latent"]
    dl = packed["dl"]
    w_tot = packed["w_tot"]
    gate_off = packed["gate_off"]
    compute_dtype = packed["compute_dtype"]
    w_cat = packed["w_cat"]
    b_cat = packed["b_cat"]

    out_w = _round_up(2 * d_latent, 128)          # packed (pred | x) output width

    capacity = _vmem_capacity_bytes()
    budget = capacity - (8 << 20)                 # leave compiler headroom
    if block_n is None:
        # 128-MiB parts (v5e/v6e) take bigger batch tiles; 512 default for v7x.
        block_n = 1024 if capacity >= (96 << 20) else 512

    # --- batch tile: minimal padding, >=2 grid steps (v7x megacore), fits VMEM ---
    n8 = _round_up(max(N, 8), 8)
    steps = max(1, _cdiv(n8, block_n))
    if n8 >= 16:
        steps = max(steps, 2)
    tile_n = _round_up(_cdiv(n8, steps), 8)
    while (tile_n > 8 and
           _vmem_need_bytes(tile_n, d_in, w_tot, out_w, compute_dtype,
                            out_dtype) > budget):
        steps += 1
        tile_n = _round_up(_cdiv(n8, steps), 8)
    n_pad = steps * tile_n

    x_p = x if n_pad == N else jnp.pad(x, ((0, n_pad - N), (0, 0)))
    x_p = x_p.astype(compute_dtype)

    need = _vmem_need_bytes(tile_n, d_in, w_tot, out_w, compute_dtype, out_dtype)
    vmem_limit = int(min(budget, max(need, 32 << 20)))

    isz = jnp.dtype(compute_dtype).itemsize
    osz = jnp.dtype(out_dtype).itemsize
    cost = pl.CostEstimate(
        flops=2 * n_pad * d_in * w_tot + 8 * n_pad * d_latent,
        transcendentals=2 * n_pad,
        bytes_accessed=(x_p.size * isz + w_cat.size * isz + b_cat.size * 4
                        + n_pad * out_w * osz),
    )

    out = pl.pallas_call(
        functools.partial(_cgc_kernel, dl=dl, d_latent=d_latent, gate_off=gate_off),
        out_shape=jax.ShapeDtypeStruct((n_pad, out_w), out_dtype),
        grid=(steps,),
        in_specs=[
            pl.BlockSpec((tile_n, d_in), lambda i: (i, 0)),           # x (pipelined)
            pl.BlockSpec((d_in, w_tot), lambda i: (0, 0),
                         pipeline_mode=pl.Buffered(1)),               # weights, resident
            pl.BlockSpec((1, w_tot), lambda i: (0, 0),
                         pipeline_mode=pl.Buffered(1)),               # bias, resident
        ],
        out_specs=pl.BlockSpec((tile_n, out_w), lambda i: (i, 0)),
        compiler_params=pltpu.CompilerParams(
            dimension_semantics=("parallel",),
            vmem_limit_bytes=vmem_limit,
        ),
        cost_estimate=cost,
    )(x_p, w_cat, b_cat)

    return out[:N, :d_latent], out[:N, d_latent:2 * d_latent]


def cgc_1_2_forward(x, params, *, block_n=None, compute_dtype=jnp.float32,
                    out_dtype=jnp.float32):
    """Convenience wrapper: pack params then apply (prefer caching the pack)."""
    packed = pack_cgc_params(params, compute_dtype=compute_dtype)
    return cgc_1_2_apply(x, packed, block_n=block_n, out_dtype=out_dtype)


def init_params(key, d_input, d_latent):
    ks = jax.random.split(key, 10)
    s_e = 1.0 / jnp.sqrt(jnp.float32(d_input))
    return {
        "w_sh": jax.random.normal(ks[0], (d_input, d_latent), jnp.float32) * s_e,
        "b_sh": jax.random.normal(ks[1], (1, d_latent), jnp.float32) * 0.01,
        "w_pr": jax.random.normal(ks[2], (d_input, d_latent), jnp.float32) * s_e,
        "b_pr": jax.random.normal(ks[3], (1, d_latent), jnp.float32) * 0.01,
        "w_x": jax.random.normal(ks[4], (d_input, d_latent), jnp.float32) * s_e,
        "b_x": jax.random.normal(ks[5], (1, d_latent), jnp.float32) * 0.01,
        "wg_pr": jax.random.normal(ks[6], (d_input, 2), jnp.float32) * s_e,
        "bg_pr": jax.random.normal(ks[7], (1, 2), jnp.float32) * 0.01,
        "wg_x": jax.random.normal(ks[8], (d_input, 2), jnp.float32) * s_e,
        "bg_x": jax.random.normal(ks[9], (1, 2), jnp.float32) * 0.01,
    }


def _reference(x, p):
    """Pure-JAX reference mirroring the PyTorch forward."""
    def expert(w, b):
        return jnp.maximum(x @ w + b, 0.0)

    def gate(w, b):
        return jax.nn.softmax(x @ w + b, axis=-1)

    h_sh = expert(p["w_sh"], p["b_sh"])[:, None, :]
    h_pr = expert(p["w_pr"], p["b_pr"])[:, None, :]
    h_x = expert(p["w_x"], p["b_x"])[:, None, :]
    g_pr = gate(p["wg_pr"], p["bg_pr"])
    g_x = gate(p["wg_x"], p["bg_x"])
    res_pred = jnp.einsum("ne,ned->ned", g_pr,
                          jnp.concatenate([h_sh, h_pr], axis=1)).sum(axis=1)
    res_x = jnp.einsum("ne,ned->ned", g_x,
                       jnp.concatenate([h_sh, h_x], axis=1)).sum(axis=1)
    return res_pred, res_x


if __name__ == "__main__":
    N, d_input, d_latent = 8, 32, 32
    key = jax.random.PRNGKey(0)
    kx, kp = jax.random.split(key)
    x = jax.random.normal(kx, (N, d_input), jnp.float32)
    params = init_params(kp, d_input, d_latent)

    # Pack once (hoisted out of the per-call path), then apply.
    packed = pack_cgc_params(params, compute_dtype=jnp.float32)
    res_pred, res_x = cgc_1_2_apply(x, packed)
    jax.block_until_ready((res_pred, res_x))

    ref_pred, ref_x = _reference(x, params)
    assert res_pred.shape == ref_pred.shape and res_x.shape == ref_x.shape
    assert jnp.allclose(res_pred, ref_pred, atol=1e-5, rtol=1e-5)
    assert jnp.allclose(res_x, ref_x, atol=1e-5, rtol=1e-5)

    print("KERNEL_OK")
</pallas_src>

<mosaic_0001>
module attributes {stable_mosaic.version = 11 : i64} {
  func.func @_cgc_kernel(%arg0: i32, %arg1: memref<8x32xf32, #tpu.memory_space<vmem>>, %arg2: memref<32x384xf32, #tpu.memory_space<vmem>>, %arg3: memref<1x384xf32, #tpu.memory_space<vmem>>, %arg4: memref<8x128xf32, #tpu.memory_space<vmem>>) attributes {dimension_semantics = [#tpu.dimension_semantics<parallel>], iteration_bounds = array<i64: 1>, scalar_prefetch = 0 : i64, scratch_operands = 0 : i64, tpu.core_type = #tpu.core_type<tc>, window_params = [{transform_indices = @transform_0, window_bounds = array<i64: 8, 32>}, {pipeline_mode = #tpu.pipeline_mode<synchronous>, transform_indices = @transform_1, window_bounds = array<i64: 32, 384>}, {pipeline_mode = #tpu.pipeline_mode<synchronous>, transform_indices = @transform_2, window_bounds = array<i64: 1, 384>}, {transform_indices = @transform_3, window_bounds = array<i64: 8, 128>}]} {
    %c0 = arith.constant 0 : index
    %c0_0 = arith.constant 0 : index
    %0 = vector.load %arg1[%c0, %c0_0] : memref<8x32xf32, #tpu.memory_space<vmem>>, vector<8x32xf32>
    %c0_1 = arith.constant 0 : index
    %c0_2 = arith.constant 0 : index
    %1 = vector.load %arg2[%c0_1, %c0_2] : memref<32x384xf32, #tpu.memory_space<vmem>>, vector<32x384xf32>
    %cst = arith.constant dense<0.000000e+00> : vector<8x384xf32>
    %2 = tpu.matmul %0, %1, %cst {dimension_numbers = #tpu.dot_dimension_numbers<[1], [0], [0], [1], [0, 0, 1, 1], [], []>} : vector<8x32xf32>, vector<32x384xf32>, vector<8x384xf32> -> vector<8x384xf32>
    %c0_3 = arith.constant 0 : index
    %c0_4 = arith.constant 0 : index
    %3 = vector.load %arg3[%c0_3, %c0_4] : memref<1x384xf32, #tpu.memory_space<vmem>>, vector<1x384xf32>
    %4 = vector.broadcast %3 : vector<1x384xf32> to vector<8x384xf32>
    %5 = arith.addf %2, %4 : vector<8x384xf32>
    %6 = vector.extract_strided_slice %5 {offsets = [0, 288], sizes = [8, 1], strides = [1, 1]} : vector<8x384xf32> to vector<8x1xf32>
    %7 = arith.negf %6 : vector<8x1xf32>
    %8 = math.exp %7 : vector<8x1xf32>
    %cst_5 = arith.constant 1.000000e+00 : f32
    %9 = vector.broadcast %cst_5 : f32 to vector<8x1xf32>
    %10 = arith.addf %9, %8 : vector<8x1xf32>
    %11 = arith.divf %9, %10 : vector<8x1xf32>
    %12 = vector.extract_strided_slice %5 {offsets = [0, 289], sizes = [8, 1], strides = [1, 1]} : vector<8x384xf32> to vector<8x1xf32>
    %13 = arith.negf %12 : vector<8x1xf32>
    %14 = math.exp %13 : vector<8x1xf32>
    %cst_6 = arith.constant 1.000000e+00 : f32
    %15 = vector.broadcast %cst_6 : f32 to vector<8x1xf32>
    %16 = arith.addf %15, %14 : vector<8x1xf32>
    %17 = arith.divf %15, %16 : vector<8x1xf32>
    %18 = vector.extract_strided_slice %5 {offsets = [0, 0], sizes = [8, 128], strides = [1, 1]} : vector<8x384xf32> to vector<8x128xf32>
    %cst_7 = arith.constant 0.000000e+00 : f32
    %19 = vector.broadcast %cst_7 : f32 to vector<8x128xf32>
    %20 = arith.maximumf %18, %19 : vector<8x128xf32>
    %21 = vector.extract_strided_slice %5 {offsets = [0, 128], sizes = [8, 128], strides = [1, 1]} : vector<8x384xf32> to vector<8x128xf32>
    %cst_8 = arith.constant 0.000000e+00 : f32
    %22 = vector.broadcast %cst_8 : f32 to vector<8x128xf32>
    %23 = arith.maximumf %21, %22 : vector<8x128xf32>
    %24 = vector.extract_strided_slice %5 {offsets = [0, 256], sizes = [8, 128], strides = [1, 1]} : vector<8x384xf32> to vector<8x128xf32>
    %cst_9 = arith.constant 0.000000e+00 : f32
    %25 = vector.broadcast %cst_9 : f32 to vector<8x128xf32>
    %26 = arith.maximumf %24, %25 : vector<8x128xf32>
    %27 = arith.subf %20, %23 : vector<8x128xf32>
    %28 = vector.broadcast %11 : vector<8x1xf32> to vector<8x128xf32>
    %29 = arith.mulf %28, %27 : vector<8x128xf32>
    %30 = arith.addf %23, %29 : vector<8x128xf32>
    %31 = arith.subf %20, %26 : vector<8x128xf32>
    %32 = vector.broadcast %17 : vector<8x1xf32> to vector<8x128xf32>
    %33 = arith.mulf %32, %31 : vector<8x128xf32>
    %34 = arith.addf %26, %33 : vector<8x128xf32>
    %35 = vector.extract_strided_slice %30 {offsets = [0, 0], sizes = [8, 32], strides = [1, 1]} : vector<8x128xf32> to vector<8x32xf32>
    %36 = vector.extract_strided_slice %34 {offsets = [0, 0], sizes = [8, 32], strides = [1, 1]} : vector<8x128xf32> to vector<8x32xf32>
    %cst_10 = arith.constant 0.000000e+00 : f32
    %37 = vector.broadcast %cst_10 : f32 to vector<8x64xf32>
    %38 = tpu.concatenate %35, %36, %37 in 1 : vector<8x32xf32>, vector<8x32xf32>, vector<8x64xf32> -> vector<8x128xf32>
    %c0_11 = arith.constant 0 : index
    %c0_12 = arith.constant 0 : index
    %39 = vector.load %arg4[%c0_11, %c0_12] : memref<8x128xf32, #tpu.memory_space<vmem>>, vector<8x128xf32>
    tpu.vector_store %arg4[%c0_11, %c0_12], %38 {strides = array<i32>} : memref<8x128xf32, #tpu.memory_space<vmem>>, vector<8x128xf32>,
    return
  }
  func.func @transform_0(%arg0: i32) -> (i32, i32) {
    %c0_i32 = arith.constant 0 : i32
    %c0_i32_0 = arith.constant 0 : i32
    return %arg0, %c0_i32 : i32, i32
  }
  func.func @transform_1(%arg0: i32) -> (i32, i32) {
    %c0_i32 = arith.constant 0 : i32
    %c0_i32_0 = arith.constant 0 : i32
    %c0_i32_1 = arith.constant 0 : i32
    return %c0_i32, %c0_i32_0 : i32, i32
  }
  func.func @transform_2(%arg0: i32) -> (i32, i32) {
    %c0_i32 = arith.constant 0 : i32
    %c0_i32_0 = arith.constant 0 : i32
    %c0_i32_1 = arith.constant 0 : i32
    return %c0_i32, %c0_i32_0 : i32, i32
  }
  func.func @transform_3(%arg0: i32) -> (i32, i32) {
    %c0_i32 = arith.constant 0 : i32
    %c0_i32_0 = arith.constant 0 : i32
    return %arg0, %c0_i32 : i32, i32
  }
}

</mosaic_0001>

<bundles_post_ra>
// kernel: tpu_custom_call.1
= control target key start
LH: loop header
LB: loop body
LE: loop exit
PB: predicated region body
PF: predicated region fallthrough
CT: control target
= control target key end

     0   :  { %8 = vsyncpa [#allocation3], 0  ;;  %s467_s0 = inlined_call_operand.hbm [shape: f32[8,32], index: 0, kind: input, shape index: {}]   ;;  %s468_s1 = inlined_call_operand.hbm [shape: f32[32,384], index: 1, kind: input, shape index: {}]   ;;  %s469_s2 = inlined_call_operand.vmem [shape: f32[1,384], index: 2, kind: input, shape index: {}]   ;;  %s470_s3 = inlined_call_operand.hbm [shape: f32[8,128], index: 3, kind: output, shape index: {}]  }
   0x1   :  { %9 = vsyncpa [#allocation6], 0 }
   0x2   :  { %10 = vsyncpa [#allocation4], 0  ;;  %s387_s12 = smov [#allocation2]   ;;  %s388_s14 = smov [#allocation5]  }
   0x3   :  { %s17_s13 = sshll.u32 %s387_s12, 4  ;;  %s26_s15 = sshll.u32 %s388_s14, 4  ;;  %s18_s13 = int_to_ptr.vmem [resolvable:$true] %s17_s13  ;;  %s418_s15 = int_to_ptr.vmem [resolvable:$true] %s26_s15 }
   0x4   :  { %s315_s18 = scalar_lea.hbm %s467_s0, 128 }
   0x5   :  { %p316_p0 = scmp.ne.s32.totalorder %s467_s0, %s315_s18  ;;  %p319_p1 = scmp.lt.u32.totalorder %s315_s18, %s467_s0 }
   0x7   :  { %p321_p2 = pnand %p319_p1, %p316_p0 }
   0x9   :  { %324 = shalt.err (!%p321_p2)
}
   0xa   :  { %s325_s23 = scalar_lea.vmem %s18_s13, 128  ;;  %p330_p4 = scmp.lt.s32.totalorder %s18_s13, %s18_s13 }
   0xb   :  { %p326_p3 = scmp.ne.s32.totalorder %s18_s13, %s325_s23  ;;  %p331_p5 = scmp.lt.s32.totalorder %s325_s23, %s325_s23 }
   0xd   :  { %p332_p6 = por %p331_p5, %p330_p4 }
   0xf   :  { %p333_p7 = pnand %p332_p6, %p326_p3 }
  0x11   :  { %336 = shalt.err (!%p333_p7)
}
  0x12   :  { %20 = dma.hbm_to_vmem [thread:$0]  %s467_s0, 128, %s18_s13, [#allocation3]  }
  0x13   :  { %s337_s28 = scalar_lea.hbm %s468_s1, 1536 }
  0x14   :  { %p338_p8 = scmp.ne.s32.totalorder %s468_s1, %s337_s28  ;;  %p341_p9 = scmp.lt.u32.totalorder %s337_s28, %s468_s1 }
  0x16   :  { %p343_p10 = pnand %p341_p9, %p338_p8 }
  0x18   :  { %346 = shalt.err (!%p343_p10)
}
  0x19   :  { %s347_s6 = scalar_lea.vmem %s418_s15, 1536  ;;  %p352_p12 = scmp.lt.s32.totalorder %s418_s15, %s418_s15 }
  0x1a   :  { %p348_p11 = scmp.ne.s32.totalorder %s418_s15, %s347_s6  ;;  %p353_p13 = scmp.lt.s32.totalorder %s347_s6, %s347_s6 }
  0x1c   :  { %p354_p0 = por %p353_p13, %p352_p12 }
  0x1e   :  { %p355_p1 = pnand %p354_p0, %p348_p11 }
  0x20   :  { %358 = shalt.err (!%p355_p1)
}
  0x21   :  { %s389_s0 = smov 384   ;;  %s390_s7 = smov 24  }
  0x22   :  { %32 = dma.hbm_to_vmem [thread:$0]  %s468_s1, 1536, %s418_s15, [#allocation6], %s389_s0, %s389_s0, %s390_s7  }
  0x23   :  { %381 = dma.done.wait [#allocation3], 128  }
  0x24   :  { %382 = vsyncadd [#allocation3], 4294967168 }
  0x25   :  { %383 = dma.done.wait [#allocation6], 1536  }
  0x26   :  { %384 = vsyncadd [#allocation6], 4294965760  ;;  %v391_v0 = vmov 0.0|0.0   ;;  %vm392_vm0 = vmmov 0   ;;  %v393_v1 = vmov 0.0   ;;  %v43_v2 = vld [vmem:[#allocation5 + $0x8] sm:$0xff]  ;;  %v56_v22 = vlaneseq }
  0x27   :  { %291 = vmatprep.subr.bf16.mxu1 %v391_v0  ;;  %280 = vmatprep.mubr.msk.f32.mxu1 %vm392_vm0, %v393_v1  ;;  %v46_v3 = vld [vmem:[#allocation5 + $0x20] sm:$0xff]  ;;  %v44_v4 = vld [vmem:[#allocation5 + $0x10] sm:$0xff]  ;;  %v47_v6 = vld [vmem:[#allocation5 + $0x28] sm:$0xff]  ;;  %vm71_vm1 = vcmask 261120   ;;  %v394_v21 = vmov 33   ;;  %v395_v47 = vmov 32  }
  0x28   :  { %139 = vmatprep.mubr.f32.mxu0 %v393_v1  ;;  %v283_v5 = vpack.c.bf16 %v46_v3, %v43_v2  ;;  %v42_v7 = vld [vmem:[#allocation5] sm:$0xff]  ;;  %v45_v8 = vld [vmem:[#allocation5 + $0x18] sm:$0xff]  ;;  %v292_v9 = vpack.c.bf16 %v47_v6, %v44_v4  ;;  %v52_v12 = vld [vmem:[#allocation5 + $0x50] sm:$0xff]  ;;  %308 = vset.pattern.permute.xlu0 %v394_v21  ;;  %v57_v23 = vshrl.u32 %v56_v22, 7  ;;  %s397_s11 = smov [#allocation7]   ;;  %vm245_vm2 = vcmask 523264  }
  0x29   :  { %v285_v10 = vpack.c.bf16 %v45_v8, %v42_v7  ;;  %v49_v11 = vld [vmem:[#allocation5 + $0x38] sm:$0xff]  ;;  %v50_v13 = vld [vmem:[#allocation5 + $0x40] sm:$0xff]  ;;  %v48_v16 = vld [vmem:[#allocation5 + $0x30] sm:$0xff]  ;;  %s254_s12 = sshll.u32 %s397_s11, 4  ;;  %s255_s12 = int_to_ptr.vmem [resolvable:$true] %s254_s12 }
  0x2a   :  { %284 = vmatprep.subr.bf16.mxu0 %v283_v5  ;;  %v287_v14 = vpack.c.bf16 %v52_v12, %v49_v11  ;;  %v53_v15 = vld [vmem:[#allocation5 + $0x58] sm:$0xff]  ;;  %v51_v17 = vld [vmem:[#allocation5 + $0x48] sm:$0xff]  ;;  %293 = vmatpush3.bf16.msra.mxu1 %v292_v9  ;;  %v66_v24 = vsub.s32 2, %v57_v23  ;;  %v58_v25 = vsub.s32 0, %v57_v23  ;;  %v62_v39 = vsub.s32 1, %v57_v23  ;;  %s359_s13 = scalar_lea.vmem %s255_s12, 128  ;;  %p364_p3 = scmp.lt.s32.totalorder %s255_s12, %s255_s12 }
  0x2b   :  { %286 = vmatpush1.bf16.msra.mxu0 %v285_v10  ;;  %v295_v18 = vpack.c.bf16 %v53_v15, %v50_v13  ;;  %v289_v19 = vpack.c.bf16 %v51_v17, %v48_v16  ;;  %294 = vmatprep.subr.bf16.mxu1 %v391_v0  ;;  %v41_v20 = vld [vmem:[#allocation2] sm:$0xff]  ;;  %p360_p2 = scmp.ne.s32.totalorder %s255_s12, %s359_s13  ;;  %p365_p4 = scmp.lt.s32.totalorder %s359_s13, %s359_s13 }
  0x2c   :  { %288 = vmatprep.subr.bf16.mxu0 %v287_v14  ;;  %v54_v26 = vld [vmem:[%s469_s2] sm:$0x7]  ;;  %s396_s2 = smov 32  }
  0x2d   :  { %v67_v27 = vrot.slane %v54_v26, %v66_v24  ;;  %v59_v28 = vrot.slane %v54_v26, %v58_v25  ;;  %v63_v41 = vrot.slane %v54_v26, %v62_v39  ;;  %p366_p5 = por %p365_p4, %p364_p3 }
  0x2e   :  { %296 = vmatpush3.bf16.msra.mxu1 %v295_v18 }
  0x2f   :  { %290 = vmatpush1.bf16.msra.mxu0 %v289_v19  ;;  %p367_p6 = pnand %p366_p5, %p360_p2 }
  0x31   :  { %281 = vmatmul.mubr.msk.f32.vlgmr.msra.gmra.mrb[0].mxu1 %vm71_vm1, %v41_v20 }
  0x32   :  { %264 = vmatmul.mubr.msk.f32.vlgmr.msra.gmra.mrb[0].mxu0 %vm71_vm1, %v41_v20 }
 0x104   :  { %v212_v29 = vpop.f32.mrb[0].mxu1 }
 0x105   :  { %v141_v30 = vpop.f32.mrb[0].mxu0  ;;  %v213_v31 = vadd.f32 %v212_v29, %v67_v27  ;;  %v282_v33 = vpop.f32.mrb[1].mxu1 }
 0x106   :  { %v142_v32 = vadd.f32 %v141_v30, %v59_v28  ;;  %v143_v34 = vpop.f32.mrb[1].mxu0 }
 0x107   :  { %v266_v35 = vmul.f32 -1.442695, %v213_v31  ;;  %v224_v36 = vmax.f32 %v213_v31, 0.0  ;;  %v144_v43 = vadd.f32 %v143_v34, %v63_v41 }
 0x108   :  { %v222_v37 = vmax.f32 %v142_v32, 0.0 }
 0x109   :  { %311 = vpow2.f32 %v266_v35  ;;  %v223_v44 = vmax.f32 %v144_v43, 0.0 }
 0x10a   :  { %v233_v38 = vsub.f32 %v222_v37, %v224_v36 }
 0x10b   :  { %v225_v45 = vsub.f32 %v222_v37, %v223_v44 }
 0x113   :  { %v312_v40 = vpop.eup %311 }
 0x114   :  { %v219_v42 = vadd.f32 1.0, %v312_v40 }
 0x116   :  { %313 = vrcp.f32 %v219_v42 }
 0x120   :  { %v314_v46 = vpop.eup %313 }
 0x121   :  { %235 = vperm.xlu0 %308, %v314_v46  }
 0x125   :  { %309 = vset.pattern.permute.xlu0 %v395_v47 }
 0x126   :  { %228 = vperm.xlu0 %309, %v314_v46  }
 0x12a   :  { %310 = vset.pattern.permute.xlu0 %v394_v21 }
 0x1a0   :  { %v236_v48 = vpop.permute.xlu0 %235 }
 0x1a1   :  { %v238_v49 = vmul.f32 %v236_v48, %v233_v38 }
 0x1a3   :  { %v239_v50 = vadd.f32 %v238_v49, %v224_v36 }
 0x1a5   :  { %v229_v51 = vpop.permute.xlu0 %228  ;;  %241 = vrot.lane.b32.xlu1 %v239_v50, %s396_s2 }
 0x1a6   :  { %v231_v52 = vmul.f32 %v229_v51, %v225_v45 }
 0x1a8   :  { %v232_v53 = vadd.f32 %v231_v52, %v223_v44 }
 0x217   :  { %v242_v54 = vpop.permute.xlu1 %241 }
 0x218   :  { %v244_v55 = vsel %vm71_vm1, %v232_v53, %v242_v54 }
 0x219   :  { %v246_v56 = vsel %vm245_vm2, %v244_v55, 0.0 }
 0x21a   :  { %247 = vst [vmem:[#allocation7] sm:$0xff] %v246_v56 }
 0x21b   :  { %370 = shalt.err (!%p367_p6)
}
 0x21c   :  { %s371_s16 = scalar_lea.hbm %s470_s3, 128 }
 0x21d   :  { %p372_p7 = scmp.ne.s32.totalorder %s470_s3, %s371_s16  ;;  %p375_p8 = scmp.lt.u32.totalorder %s371_s16, %s470_s3 }
 0x21f   :  { %p377_p9 = pnand %p375_p8, %p372_p7 }
 0x221   :  { %380 = shalt.err (!%p377_p9)
}
 0x222   :  { %257 = dma.vmem_to_hbm [thread:$0]  %s255_s12, 128, %s470_s3, [#allocation4]  }
 0x223   :  { %385 = dma.done.wait [#allocation4], 128  }
 0x224   :  { %386 = vsyncadd [#allocation4], 4294967168 }
 0x225   :  { %261 = vsyncpa [#allocation3], 1 }
 0x226   :  { %262 = vsyncpa [#allocation6], 1 }
 0x227   :  { %263 = vsyncpa [#allocation4], 1 }

</bundles_post_ra>
